<compile_context>
chip_gen: v7x
topology: tpu7x:2x2x1
jax: 0.10.0
libtpu: 0.0.40
codegen_flags: <defaults>
</compile_context>

<pallas_src>
import jax
import jax.numpy as jnp
from jax.experimental import pallas as pl
from jax.experimental.pallas import tpu as pltpu


def _minibatch_std_kernel(x_ref, o_ref):
    x = x_ref[...]                                  # (N, C, T) block, input dtype
    n, c, t = x.shape

    # Single up-cast; all arithmetic in f32 (v5e has no bf16 VPU/EUP path).
    xf = x.astype(jnp.float32)

    # Unbiased std over the batch dim (matches torch.std default).
    # NOTE: n == 1 gives 0/0 -> NaN, identical to torch.std behaviour.
    mean = jnp.mean(xf, axis=0, keepdims=True)                      # (1, C, T)
    var = jnp.sum((xf - mean) ** 2, axis=0) / jnp.float32(n - 1)    # (C, T)
    std = jnp.sqrt(var)                                             # (C, T)

    # Mean over channels -> one statistic per spatial position.
    stat = jnp.mean(std, axis=0, keepdims=True).astype(o_ref.dtype)  # (1, T)

    # Pass-through: stream x straight into the first C output channels.
    o_ref[:, :c, :] = x

    # Extra channel: store the same (1, T) slab for every batch element
    # (static unroll; avoids building an (N, 1, T) broadcast in registers).
    for i in range(n):
        o_ref[i, c:c + 1, :] = stat


def _pick_tile(hw, n, c, itemsize):
    """Largest lane-dense tile whose double-buffered in+out blocks fit VMEM."""
    # Budget chosen to stay under the default scoped VMEM limit on every
    # generation, including v7x (32 MiB default / 64 MiB physical).
    budget = 24 * 1024 * 1024
    candidates = [t for t in (4096, 2048, 1024, 512, 256, 128) if hw % t == 0]
    for t in candidates:
        # 2 buffers each for the input block and the output block.
        if 2 * (n * c + n * (c + 1)) * t * itemsize <= budget:
            return t
    if candidates:
        return candidates[-1]
    # hw not a multiple of 128: a single full-extent block is the only legal choice.
    return hw


def minibatch_std(x):
    n, c, h, w = x.shape
    hw = h * w
    itemsize = jnp.dtype(x.dtype).itemsize

    # Lane-dense layout: flatten spatial dims outside the kernel (free plumbing).
    x3 = x.reshape(n, c, hw)

    tile = _pick_tile(hw, n, c, itemsize)
    grid = (hw // tile,)

    cost = pl.CostEstimate(
        flops=4 * n * c * hw,              # sub, square, reduce-add, scale (approx)
        transcendentals=c * hw,            # sqrt per (channel, spatial) element
        bytes_accessed=n * c * hw * itemsize + n * (c + 1) * hw * itemsize,
    )

    out3 = pl.pallas_call(
        _minibatch_std_kernel,
        out_shape=jax.ShapeDtypeStruct((n, c + 1, hw), x.dtype),
        grid=grid,
        in_specs=[pl.BlockSpec((n, c, tile), lambda s: (0, 0, s))],
        out_specs=pl.BlockSpec((n, c + 1, tile), lambda s: (0, 0, s)),
        compiler_params=pltpu.CompilerParams(
            dimension_semantics=("parallel",),   # shards across v7x's 2 TCs
        ),
        cost_estimate=cost,
    )(x3)

    return out3.reshape(n, c + 1, h, w)


def _reference(x):
    # Pure-JAX reference matching torch semantics.
    xf = x.astype(jnp.float32)
    std = jnp.std(xf, axis=0, ddof=1)          # (C, H, W), unbiased
    stat = jnp.mean(std, axis=0)               # (H, W)
    stat_b = jnp.broadcast_to(
        stat[None, None], (x.shape[0], 1, x.shape[2], x.shape[3])
    )
    return jnp.concatenate([x, stat_b.astype(x.dtype)], axis=1)


if __name__ == "__main__":
    key = jax.random.PRNGKey(0)
    x = jax.random.normal(key, (2, 4, 16, 16), dtype=jnp.float32)

    out = minibatch_std(x)
    jax.block_until_ready(out)

    ref = _reference(x)
    assert out.shape == (2, 5, 16, 16), out.shape
    assert jnp.allclose(out, ref, atol=1e-5, rtol=1e-5), "mismatch vs reference"

    print("KERNEL_OK")
</pallas_src>

<mosaic_0001>
module attributes {stable_mosaic.version = 11 : i64} {
  func.func @_minibatch_std_kernel(%arg0: i32, %arg1: memref<2x4x256xf32, #tpu.memory_space<vmem>>, %arg2: memref<2x5x256xf32, #tpu.memory_space<vmem>>) attributes {dimension_semantics = [#tpu.dimension_semantics<parallel>], iteration_bounds = array<i64: 1>, scalar_prefetch = 0 : i64, scratch_operands = 0 : i64, tpu.core_type = #tpu.core_type<tc>, window_params = [{transform_indices = @transform_0, window_bounds = array<i64: 2, 4, 256>}, {transform_indices = @transform_1, window_bounds = array<i64: 2, 5, 256>}]} {
    %c0 = arith.constant 0 : index
    %c0_0 = arith.constant 0 : index
    %c0_1 = arith.constant 0 : index
    %0 = vector.load %arg1[%c0, %c0_0, %c0_1] : memref<2x4x256xf32, #tpu.memory_space<vmem>>, vector<2x4x256xf32>
    %cst = arith.constant dense<0.000000e+00> : vector<4x256xf32>
    %1 = vector.multi_reduction <add>, %0, %cst [0] : vector<2x4x256xf32> to vector<4x256xf32>
    %2 = vector.shape_cast %1 : vector<4x256xf32> to vector<1x4x256xf32>
    %cst_2 = arith.constant 2.000000e+00 : f32
    %3 = vector.broadcast %cst_2 : f32 to vector<1x4x256xf32>
    %4 = arith.divf %2, %3 : vector<1x4x256xf32>
    %5 = vector.broadcast %4 : vector<1x4x256xf32> to vector<2x4x256xf32>
    %6 = arith.subf %0, %5 : vector<2x4x256xf32>
    %7 = arith.mulf %6, %6 : vector<2x4x256xf32>
    %cst_3 = arith.constant dense<0.000000e+00> : vector<4x256xf32>
    %8 = vector.multi_reduction <add>, %7, %cst_3 [0] : vector<2x4x256xf32> to vector<4x256xf32>
    %cst_4 = arith.constant 1.000000e+00 : f32
    %9 = vector.broadcast %cst_4 : f32 to vector<4x256xf32>
    %10 = arith.divf %8, %9 : vector<4x256xf32>
    %11 = math.sqrt %10 : vector<4x256xf32>
    %cst_5 = arith.constant dense<0.000000e+00> : vector<256xf32>
    %12 = vector.multi_reduction <add>, %11, %cst_5 [0] : vector<4x256xf32> to vector<256xf32>
    %13 = vector.shape_cast %12 : vector<256xf32> to vector<1x256xf32>
    %cst_6 = arith.constant 4.000000e+00 : f32
    %14 = vector.broadcast %cst_6 : f32 to vector<1x256xf32>
    %15 = arith.divf %13, %14 : vector<1x256xf32>
    %c0_7 = arith.constant 0 : index
    %c0_8 = arith.constant 0 : index
    %c0_9 = arith.constant 0 : index
    %16 = vector.load %arg2[%c0_7, %c0_8, %c0_9] : memref<2x5x256xf32, #tpu.memory_space<vmem>>, vector<2x4x256xf32>
    tpu.vector_store %arg2[%c0_7, %c0_8, %c0_9], %0 {strides = array<i32>} : memref<2x5x256xf32, #tpu.memory_space<vmem>>, vector<2x4x256xf32>,
    %c0_10 = arith.constant 0 : index
    %c4 = arith.constant 4 : index
    %c0_11 = arith.constant 0 : index
    %17 = vector.load %arg2[%c0_10, %c4, %c0_11] : memref<2x5x256xf32, #tpu.memory_space<vmem>>, vector<1x1x256xf32>
    %18 = vector.shape_cast %17 : vector<1x1x256xf32> to vector<1x256xf32>
    %19 = vector.shape_cast %15 : vector<1x256xf32> to vector<1x1x256xf32>
    tpu.vector_store %arg2[%c0_10, %c4, %c0_11], %19 {strides = array<i32>} : memref<2x5x256xf32, #tpu.memory_space<vmem>>, vector<1x1x256xf32>,
    %c1 = arith.constant 1 : index
    %c4_12 = arith.constant 4 : index
    %c0_13 = arith.constant 0 : index
    %20 = vector.load %arg2[%c1, %c4_12, %c0_13] : memref<2x5x256xf32, #tpu.memory_space<vmem>>, vector<1x1x256xf32>
    %21 = vector.shape_cast %20 : vector<1x1x256xf32> to vector<1x256xf32>
    %22 = vector.shape_cast %15 : vector<1x256xf32> to vector<1x1x256xf32>
    tpu.vector_store %arg2[%c1, %c4_12, %c0_13], %22 {strides = array<i32>} : memref<2x5x256xf32, #tpu.memory_space<vmem>>, vector<1x1x256xf32>,
    return
  }
  func.func @transform_0(%arg0: i32) -> (i32, i32, i32) {
    %c0_i32 = arith.constant 0 : i32
    %c0_i32_0 = arith.constant 0 : i32
    %c0_i32_1 = arith.constant 0 : i32
    return %c0_i32, %c0_i32_0, %arg0 : i32, i32, i32
  }
  func.func @transform_1(%arg0: i32) -> (i32, i32, i32) {
    %c0_i32 = arith.constant 0 : i32
    %c0_i32_0 = arith.constant 0 : i32
    %c0_i32_1 = arith.constant 0 : i32
    return %c0_i32, %c0_i32_0, %arg0 : i32, i32, i32
  }
}

</mosaic_0001>

<bundles_post_ra>
// kernel: tpu_custom_call.1
= control target key start
LH: loop header
LB: loop body
LE: loop exit
PB: predicated region body
PF: predicated region fallthrough
CT: control target
= control target key end

     0   :  { %6 = vsyncpa [#allocation3], 0  ;;  %s166_s6 = smov [#allocation2]   ;;  %s220_s0 = inlined_call_operand.hbm [shape: f32[2,4,256], index: 0, kind: input, shape index: {}]   ;;  %s221_s1 = inlined_call_operand.vmem [shape: f32[2,5,256], index: 1, kind: output, shape index: {}]  }
   0x1   :  { %s12_s7 = sshll.u32 %s166_s6, 4  ;;  %s142_s10 = scalar_lea.hbm %s220_s0, 256  ;;  %s13_s7 = int_to_ptr.vmem [resolvable:$true] %s12_s7 }
   0x2   :  { %p143_p0 = scmp.ne.s32.totalorder %s220_s0, %s142_s10  ;;  %p146_p1 = scmp.lt.u32.totalorder %s142_s10, %s220_s0 }
   0x4   :  { %p148_p2 = pnand %p146_p1, %p143_p0 }
   0x6   :  { %151 = shalt.err (!%p148_p2)
}
   0x7   :  { %s152_s15 = scalar_lea.vmem %s13_s7, 256  ;;  %p157_p4 = scmp.lt.s32.totalorder %s13_s7, %s13_s7 }
   0x8   :  { %p153_p3 = scmp.ne.s32.totalorder %s13_s7, %s152_s15  ;;  %p158_p5 = scmp.lt.s32.totalorder %s152_s15, %s152_s15 }
   0xa   :  { %p159_p6 = por %p158_p5, %p157_p4 }
   0xc   :  { %p160_p7 = pnand %p159_p6, %p153_p3 }
   0xe   :  { %163 = shalt.err (!%p160_p7)
}
   0xf   :  { %s167_s16 = smov 128   ;;  %s168_s17 = smov 8  }
  0x10   :  { %18 = dma.hbm_to_vmem [thread:$0]  %s220_s0, 256, %s13_s7, [#allocation3], %s167_s16, %s167_s16, %s168_s17  }
  0x11   :  { %164 = dma.done.wait [#allocation3], 256  }
  0x12   :  { %165 = vsyncadd [#allocation3], 4294967040  ;;  %vm30_vm0 = vcmask 1043456   ;;  %v22_v0 = vld [vmem:[#allocation2] sm:$0xff]  ;;  %v23_v1 = vld [vmem:[#allocation2 + $0x8] sm:$0xff]  ;;  %v101_v46 = vlaneseq }
  0x13   :  { %v31_v2 = vsel %vm30_vm0, %v22_v0, 0.0  ;;  %91 = vst [vmem:[%s221_s1] sm:$0xf] %v22_v0  ;;  %v26_v3 = vcombine.high %v22_v0, %v22_v0  ;;  %v32_v4 = vsel %vm30_vm0, %v23_v1, 0.0  ;;  %93 = vst [vmem:[%s221_s1 + $0x10] sm:$0xf] %v23_v1  ;;  %v27_v5 = vcombine.high %v23_v1, %v23_v1 }
  0x14   :  { %v33_v6 = vadd.f32 %v32_v4, %v31_v2  ;;  %v169_v44 = vmov 1966171168   ;;  %v102_v52 = vshrl.u32 %v101_v46, 7  ;;  %vm115_vm5 = vcmp.lt.s32.totalorder %v101_v46, 256 }
  0x15   :  { %v34_v7 = vsel %vm30_vm0, %v26_v3, 0.0  ;;  %92 = vst [vmem:[%s221_s1 + $0x8] sm:$0xf] %v26_v3  ;;  %v35_v8 = vsel %vm30_vm0, %v27_v5, 0.0  ;;  %94 = vst [vmem:[%s221_s1 + $0x18] sm:$0xf] %v27_v5  ;;  %v99_v45 = vunpack.c.l.s4 %v169_v44 }
  0x16   :  { %v36_v9 = vadd.f32 %v35_v8, %v34_v7  ;;  %v38_v10 = vmul.f32 0.5, %v33_v6 }
  0x17   :  { %v100_v51 = vunpack.c.0.s8 %v99_v45 }
  0x18   :  { %v39_v11 = vmul.f32 0.5, %v36_v9 }
  0x19   :  { %v103_v56 = vsub.s32 %v100_v51, %v102_v52 }
  0x1a   :  { %v42_v12 = vcombine.low %v38_v10, %v39_v11 }
  0x1c   :  { %v44_v13 = vsub.f32 %v22_v0, %v42_v12  ;;  %v45_v14 = vsub.f32 %v23_v1, %v42_v12 }
  0x1e   :  { %v46_v15 = vmul.f32 %v44_v13, %v44_v13  ;;  %v47_v16 = vmul.f32 %v45_v14, %v45_v14 }
  0x20   :  { %v50_v17 = vcombine.high %v46_v15, %v46_v15  ;;  %v51_v18 = vcombine.high %v47_v16, %v47_v16  ;;  %v54_v19 = vsel %vm30_vm0, %v46_v15, 0.0  ;;  %v55_v20 = vsel %vm30_vm0, %v47_v16, 0.0 }
  0x21   :  { %v56_v21 = vadd.f32 %v55_v20, %v54_v19 }
  0x22   :  { %v57_v22 = vsel %vm30_vm0, %v50_v17, 0.0  ;;  %v58_v23 = vsel %vm30_vm0, %v51_v18, 0.0 }
  0x23   :  { %v59_v24 = vadd.f32 %v58_v23, %v57_v22  ;;  %138 = vrsqrt.f32 %v56_v21  ;;  %vm62_vm1 = vcmp.eq.f32.partialorder %v56_v21, inf  ;;  %v65_v26 = vand.u32 2147483648, %v56_v21 }
  0x24   :  { %vm64_vm2 = vcmp.eq.f32.partialorder %v56_v21, 0.0 }
  0x25   :  { %140 = vrsqrt.f32 %v59_v24  ;;  %vm69_vm3 = vcmp.eq.f32.partialorder %v59_v24, inf  ;;  %v72_v29 = vand.u32 2147483648, %v59_v24  ;;  %vm71_vm4 = vcmp.eq.f32.partialorder %v59_v24, 0.0 }
  0x2d   :  { %v139_v25 = vpop.eup %138 }
  0x2e   :  { %v61_v27 = vmul.f32 %v139_v25, %v56_v21 }
  0x2f   :  { %v141_v28 = vpop.eup %140 }
  0x30   :  { %v63_v30 = vsel %vm62_vm1, %v56_v21, %v61_v27  ;;  %v68_v31 = vmul.f32 %v141_v28, %v59_v24 }
  0x31   :  { %v66_v32 = vsel %vm64_vm2, %v65_v26, %v63_v30 }
  0x32   :  { %v70_v33 = vsel %vm69_vm3, %v59_v24, %v68_v31  ;;  %v74_v34 = vsel %vm30_vm0, %v66_v32, 0.0 }
  0x33   :  { %v73_v35 = vsel %vm71_vm4, %v72_v29, %v70_v33  ;;  %v75_v36 = vrot.slane %v74_v34, 4 }
  0x34   :  { %v81_v37 = vsel %vm30_vm0, %v73_v35, 0.0 }
  0x35   :  { %v76_v38 = vadd.f32 %v75_v36, %v74_v34  ;;  %v82_v39 = vrot.slane %v81_v37, 4 }
  0x37   :  { %v77_v40 = vrot.slane %v76_v38, 2  ;;  %v83_v41 = vadd.f32 %v82_v39, %v81_v37 }
  0x39   :  { %v78_v42 = vadd.f32 %v77_v40, %v76_v38  ;;  %v84_v43 = vrot.slane %v83_v41, 2 }
  0x3b   :  { %v79_v47 = vrot.slane %v78_v42, 1  ;;  %v85_v48 = vadd.f32 %v84_v43, %v83_v41 }
  0x3d   :  { %v80_v49 = vadd.f32 %v79_v47, %v78_v42  ;;  %v86_v50 = vrot.slane %v85_v48, 1 }
  0x3f   :  { %v87_v53 = vadd.f32 %v86_v50, %v85_v48  ;;  %v89_v54 = vmul.f32 0.25, %v80_v49 }
  0x41   :  { %v90_v55 = vmul.f32 0.25, %v87_v53 }
  0x43   :  { %v97_v57 = vcombine.low %v89_v54, %v90_v55 }
  0x45   :  { %v104_v58 = vrot.slane %v97_v57, %v103_v56 }
  0x47   :  { %v111_v59 = vrot.slane %v104_v58, %v103_v56 }
  0x49   :  { %130 = vst.msk [vmem:[%s221_s1 + $0x4] ss:$8 sm:$0x3] %vm115_vm5, %v111_v59  ;;  %131 = vst.msk [vmem:[%s221_s1 + $0x14] ss:$8 sm:$0x3] %vm115_vm5, %v111_v59 }
  0x4a   :  { %128 = vsyncpa [#allocation3], 1 }

</bundles_post_ra>
